<compile_context>
chip_gen: v6e
topology: v6e:2x2x1
jax: 0.10.0
libtpu: 0.0.40
codegen_flags: <defaults>
</compile_context>

<pallas_src>
import functools

import jax
import jax.numpy as jnp
from jax.experimental import pallas as pl
from jax.experimental.pallas import tpu as pltpu


def _focal_kernel(x_ref, w_ref, b_ref, lbl_ref, loss_ref, corr_ref, *, gamma, n_valid):
    # x_ref:   (tile_n, D)     bf16
    # w_ref:   (D, C_pad)      bf16   (fc.weight transposed, class-padded with zeros)
    # b_ref:   (1, C_pad)      f32    (padded classes carry -1e30)
    # lbl_ref: (1, tile_n)     i32    (lane-dense)
    # loss_ref/corr_ref: (1, tile_n) f32 (lane-dense per-row outputs)
    tile_n = x_ref.shape[0]
    c_pad = w_ref.shape[1]

    # MXU: (tile_n, D) bf16 @ (D, C_pad) bf16 -> f32 logits, + f32 bias.
    logits = jnp.dot(x_ref[...], w_ref[...], preferred_element_type=jnp.float32)
    logits = logits + b_ref[...]                     # padded classes -> -1e30

    # One XLU transpose so every downstream vector is lane-dense (rows -> 128-lane axis).
    logits_t = jnp.transpose(logits)                 # (C_pad, tile_n) f32
    lbl = lbl_ref[...]                               # (1, tile_n) i32

    # log-softmax cross-entropy (reduction='none')
    m = jnp.max(logits_t, axis=0, keepdims=True)     # (1, tile_n)
    lse = m + jnp.log(jnp.sum(jnp.exp(logits_t - m), axis=0, keepdims=True))
    class_ids = jax.lax.broadcasted_iota(jnp.int32, logits_t.shape, 0)
    onehot = class_ids == lbl
    tgt = jnp.sum(jnp.where(onehot, logits_t, 0.0), axis=0, keepdims=True)
    logp = jnp.maximum(lse - tgt, 0.0)               # clamp: keeps 1 - p >= 0 (no NaN in pow)

    # focal weighting
    p = jnp.exp(-logp)
    loss = (1.0 - p) ** gamma * logp                 # (1, tile_n)

    # top-1 prediction, first-index tie-break (matches torch argmax/topk behaviour)
    pred = jnp.min(jnp.where(logits_t == m, class_ids, c_pad), axis=0, keepdims=True)
    corr = (pred == lbl).astype(jnp.float32)

    # zero out rows past the true N (row padding up to a multiple of tile_n)
    row = pl.program_id(0) * tile_n + jax.lax.broadcasted_iota(jnp.int32, (1, tile_n), 1)
    valid = (row < n_valid).astype(jnp.float32)
    loss_ref[...] = loss * valid
    corr_ref[...] = corr * valid


def focal_loss_forward(x, label, weight, bias, *, gamma=0.01, tile_n=256):
    """x: (B, T, D), label: (B,) int, weight: (C, D), bias: (C,) -> (loss_mean, prec1)."""
    assert x.ndim == 3
    B, T, D = x.shape
    C = weight.shape[0]
    N = B * T
    assert label.shape[0] == B
    assert tile_n % 128 == 0, "tile_n must be lane-aligned (multiple of 128)"
    # NOTE: for large D on v7x (64 MiB VMEM / 32 MiB scoped default), cap tile_n so that
    # 2 (double buffer) * tile_n * D * 2 bytes stays well under the scoped limit.

    n_tiles = -(-N // tile_n)
    n_pad = n_tiles * tile_n
    c_pad = max(128, -(-C // 128) * 128)

    # Rows: flatten, zero-pad, cast bf16 for the MXU / dominant HBM stream (contiguous DMA).
    x_flat = jnp.pad(x.reshape(N, D).astype(jnp.float32), ((0, n_pad - N), (0, 0)))
    x_flat = x_flat.astype(jnp.bfloat16)

    # Labels: repeat_interleave over T, pad, lay out lane-dense as (1, n_pad).
    lbl = jnp.repeat(label.astype(jnp.int32), T)
    lbl = jnp.pad(lbl, (0, n_pad - N)).reshape(1, n_pad)

    # fc weight transposed + class-padded with zeros; padded classes get -1e30 bias so they
    # never win the max nor contribute to the logsumexp.
    w_t = jnp.zeros((D, c_pad), jnp.float32).at[:, :C].set(
        jnp.transpose(weight).astype(jnp.float32)).astype(jnp.bfloat16)
    b_p = jnp.full((1, c_pad), -1e30, jnp.float32).at[0, :C].set(bias.astype(jnp.float32))

    kernel = functools.partial(_focal_kernel, gamma=float(gamma), n_valid=N)

    loss_rows, corr_rows = pl.pallas_call(
        kernel,
        out_shape=(
            jax.ShapeDtypeStruct((1, n_pad), jnp.float32),
            jax.ShapeDtypeStruct((1, n_pad), jnp.float32),
        ),
        grid_spec=pltpu.PrefetchScalarGridSpec(
            num_scalar_prefetch=0,
            grid=(n_tiles,),
            in_specs=[
                pl.BlockSpec((tile_n, D), lambda i: (i, 0)),   # x rows (contiguous DMA)
                pl.BlockSpec((D, c_pad), lambda i: (0, 0)),    # weight: constant block -> resident
                pl.BlockSpec((1, c_pad), lambda i: (0, 0)),    # bias:   constant block -> resident
                pl.BlockSpec((1, tile_n), lambda i: (0, i)),   # labels, lane-dense
            ],
            out_specs=(
                pl.BlockSpec((1, tile_n), lambda i: (0, i)),   # per-row focal loss, lane-dense
                pl.BlockSpec((1, tile_n), lambda i: (0, i)),   # per-row top-1 correctness
            ),
        ),
        compiler_params=pltpu.CompilerParams(
            dimension_semantics=("parallel",)),
    )(x_flat, w_t, b_p, lbl)

    # Final scalar reductions are cheap glue in plain JAX (padded rows already zeroed in-kernel).
    inv_n = 1.0 / N
    loss_mean = jnp.sum(loss_rows) * inv_n
    prec1 = jnp.sum(corr_rows) * (100.0 * inv_n)
    return loss_mean, prec1


if __name__ == "__main__":
    def make_inputs(key, B, T, D, C):
        kx, kl, kw, kb = jax.random.split(key, 4)
        x = jax.random.normal(kx, (B, T, D), dtype=jnp.float32)
        label = jax.random.randint(kl, (B,), 0, C, dtype=jnp.int32)
        bound = 1.0 / (D ** 0.5)
        weight = jax.random.uniform(kw, (C, D), jnp.float32, -bound, bound)
        bias = jax.random.uniform(kb, (C,), jnp.float32, -bound, bound)
        return x, label, weight, bias

    def reference(x, label, weight, bias, gamma):
        B, T, D = x.shape
        xb = x.reshape(-1, D).astype(jnp.bfloat16).astype(jnp.float32)
        wb = weight.astype(jnp.bfloat16).astype(jnp.float32)
        lbl = jnp.repeat(label.astype(jnp.int32), T)
        logits = xb @ wb.T + bias.astype(jnp.float32)
        logp = jax.nn.logsumexp(logits, axis=-1) - jnp.take_along_axis(
            logits, lbl[:, None], axis=-1)[:, 0]
        p = jnp.exp(-logp)
        loss = jnp.mean((1.0 - p) ** gamma * logp)
        prec = jnp.mean((jnp.argmax(logits, -1) == lbl).astype(jnp.float32)) * 100.0
        return loss, prec

    gamma = 0.01
    k1, k2 = jax.random.split(jax.random.PRNGKey(0))

    # Case 1: module-consistent small shapes (batch=2, seq=8, embedding_dim=32, classes=16).
    x, label, weight, bias = make_inputs(k1, 2, 8, 32, 16)
    loss, prec1 = focal_loss_forward(x, label, weight, bias, gamma=gamma)
    jax.block_until_ready((loss, prec1))
    loss_r, prec_r = reference(x, label, weight, bias, gamma)
    assert jnp.allclose(loss, loss_r, rtol=2e-3, atol=2e-3), (loss, loss_r)
    assert jnp.allclose(prec1, prec_r, atol=1e-2), (prec1, prec_r)

    # Case 2: exercises multi-tile grid + row/class padding (N=288 rows -> 2 tiles, C=40 -> 128).
    x, label, weight, bias = make_inputs(k2, 3, 96, 32, 40)
    loss, prec1 = focal_loss_forward(x, label, weight, bias, gamma=gamma)
    jax.block_until_ready((loss, prec1))
    loss_r, prec_r = reference(x, label, weight, bias, gamma)
    assert jnp.allclose(loss, loss_r, rtol=2e-3, atol=2e-3), (loss, loss_r)
    assert jnp.allclose(prec1, prec_r, atol=1e-2), (prec1, prec_r)

    print("KERNEL_OK")
</pallas_src>

<mosaic_0001>
module attributes {stable_mosaic.version = 11 : i64} {
  func.func @_focal_kernel(%arg0: i32, %arg1: memref<256x32xbf16, #tpu.memory_space<vmem>>, %arg2: memref<32x128xbf16, #tpu.memory_space<vmem>>, %arg3: memref<1x128xf32, #tpu.memory_space<vmem>>, %arg4: memref<1x256xi32, #tpu.memory_space<vmem>>, %arg5: memref<1x256xf32, #tpu.memory_space<vmem>>, %arg6: memref<1x256xf32, #tpu.memory_space<vmem>>) attributes {dimension_semantics = [#tpu.dimension_semantics<parallel>], iteration_bounds = array<i64: 1>, scalar_prefetch = 0 : i64, scratch_operands = 0 : i64, tpu.core_type = #tpu.core_type<tc>, window_params = [{transform_indices = @transform_0, window_bounds = array<i64: 256, 32>}, {pipeline_mode = #tpu.pipeline_mode<synchronous>, transform_indices = @transform_1, window_bounds = array<i64: 32, 128>}, {pipeline_mode = #tpu.pipeline_mode<synchronous>, transform_indices = @transform_2, window_bounds = array<i64: 1, 128>}, {transform_indices = @transform_3, window_bounds = array<i64: 1, 256>}, {transform_indices = @transform_4, window_bounds = array<i64: 1, 256>}, {transform_indices = @transform_5, window_bounds = array<i64: 1, 256>}]} {
    %c0 = arith.constant 0 : index
    %c0_0 = arith.constant 0 : index
    %0 = vector.load %arg1[%c0, %c0_0] : memref<256x32xbf16, #tpu.memory_space<vmem>>, vector<256x32xbf16>
    %c0_1 = arith.constant 0 : index
    %c0_2 = arith.constant 0 : index
    %1 = vector.load %arg2[%c0_1, %c0_2] : memref<32x128xbf16, #tpu.memory_space<vmem>>, vector<32x128xbf16>
    %cst = arith.constant dense<0.000000e+00> : vector<256x128xf32>
    %2 = tpu.matmul %0, %1, %cst {dimension_numbers = #tpu.dot_dimension_numbers<[1], [0], [0], [1], [0, 0, 1, 1], [], []>} : vector<256x32xbf16>, vector<32x128xbf16>, vector<256x128xf32> -> vector<256x128xf32>
    %c0_3 = arith.constant 0 : index
    %c0_4 = arith.constant 0 : index
    %3 = vector.load %arg3[%c0_3, %c0_4] : memref<1x128xf32, #tpu.memory_space<vmem>>, vector<1x128xf32>
    %4 = vector.broadcast %3 : vector<1x128xf32> to vector<256x128xf32>
    %5 = arith.addf %2, %4 : vector<256x128xf32>
    %6 = tpu.transpose %5, [1, 0] : vector<256x128xf32> -> vector<128x256xf32>
    %c0_5 = arith.constant 0 : index
    %c0_6 = arith.constant 0 : index
    %7 = vector.load %arg4[%c0_5, %c0_6] : memref<1x256xi32, #tpu.memory_space<vmem>>, vector<1x256xi32>
    %cst_7 = arith.constant dense<0xFF800000> : vector<256xf32>
    %8 = vector.multi_reduction <maximumf>, %6, %cst_7 [0] : vector<128x256xf32> to vector<256xf32>
    %9 = vector.shape_cast %8 : vector<256xf32> to vector<1x256xf32>
    %10 = vector.broadcast %9 : vector<1x256xf32> to vector<128x256xf32>
    %11 = arith.subf %6, %10 : vector<128x256xf32>
    %12 = math.exp %11 : vector<128x256xf32>
    %cst_8 = arith.constant dense<0.000000e+00> : vector<256xf32>
    %13 = vector.multi_reduction <add>, %12, %cst_8 [0] : vector<128x256xf32> to vector<256xf32>
    %14 = vector.shape_cast %13 : vector<256xf32> to vector<1x256xf32>
    %15 = math.log %14 : vector<1x256xf32>
    %16 = arith.addf %9, %15 : vector<1x256xf32>
    %17 = tpu.iota {dimensions = array<i32: 0>} : vector<128x256xi32>
    %18 = vector.broadcast %7 : vector<1x256xi32> to vector<128x256xi32>
    %19 = arith.cmpi eq, %17, %18 : vector<128x256xi32>
    %cst_9 = arith.constant 0.000000e+00 : f32
    %20 = vector.broadcast %cst_9 : f32 to vector<128x256xf32>
    %21 = arith.select %19, %6, %20 : vector<128x256xi1>, vector<128x256xf32>
    %cst_10 = arith.constant dense<0.000000e+00> : vector<256xf32>
    %22 = vector.multi_reduction <add>, %21, %cst_10 [0] : vector<128x256xf32> to vector<256xf32>
    %23 = vector.shape_cast %22 : vector<256xf32> to vector<1x256xf32>
    %24 = arith.subf %16, %23 : vector<1x256xf32>
    %cst_11 = arith.constant 0.000000e+00 : f32
    %25 = vector.broadcast %cst_11 : f32 to vector<1x256xf32>
    %26 = arith.maximumf %24, %25 : vector<1x256xf32>
    %cst_12 = arith.constant 0.000000e+00 : f32
    %27 = vector.broadcast %cst_12 : f32 to vector<1x256xf32>
    %28 = arith.subf %27, %26 : vector<1x256xf32>
    %29 = math.exp %28 : vector<1x256xf32>
    %cst_13 = arith.constant 1.000000e+00 : f32
    %30 = vector.broadcast %cst_13 : f32 to vector<1x256xf32>
    %31 = arith.subf %30, %29 : vector<1x256xf32>
    %cst_14 = arith.constant 0.00999999977 : f32
    %32 = vector.broadcast %cst_14 : f32 to vector<1x256xf32>
    %33 = math.powf %31, %32 : vector<1x256xf32>
    %34 = arith.mulf %33, %26 : vector<1x256xf32>
    %35 = vector.broadcast %9 : vector<1x256xf32> to vector<128x256xf32>
    %36 = arith.cmpf oeq, %6, %35 : vector<128x256xf32>
    %c128_i32 = arith.constant 128 : i32
    %37 = vector.broadcast %c128_i32 : i32 to vector<128x256xi32>
    %38 = arith.select %36, %17, %37 : vector<128x256xi1>, vector<128x256xi32>
    %cst_15 = arith.constant dense<2147483647> : vector<256xi32>
    %39 = vector.multi_reduction <minsi>, %38, %cst_15 [0] : vector<128x256xi32> to vector<256xi32>
    %40 = vector.shape_cast %39 : vector<256xi32> to vector<1x256xi32>
    %41 = arith.cmpi eq, %40, %7 : vector<1x256xi32>
    %42 = arith.extui %41 : vector<1x256xi1> to vector<1x256xi32>
    %43 = arith.sitofp %42 : vector<1x256xi32> to vector<1x256xf32>
    %c256_i32 = arith.constant 256 : i32
    %44 = arith.muli %arg0, %c256_i32 : i32
    %45 = tpu.iota {dimensions = array<i32: 1>} : vector<1x256xi32>
    %46 = vector.broadcast %44 : i32 to vector<1x256xi32>
    %47 = arith.addi %46, %45 : vector<1x256xi32>
    %c16_i32 = arith.constant 16 : i32
    %48 = vector.broadcast %c16_i32 : i32 to vector<1x256xi32>
    %49 = arith.cmpi slt, %47, %48 : vector<1x256xi32>
    %50 = arith.extui %49 : vector<1x256xi1> to vector<1x256xi32>
    %51 = arith.sitofp %50 : vector<1x256xi32> to vector<1x256xf32>
    %52 = arith.mulf %34, %51 : vector<1x256xf32>
    %c0_16 = arith.constant 0 : index
    %c0_17 = arith.constant 0 : index
    %53 = vector.load %arg5[%c0_16, %c0_17] : memref<1x256xf32, #tpu.memory_space<vmem>>, vector<1x256xf32>
    tpu.vector_store %arg5[%c0_16, %c0_17], %52 {strides = array<i32>} : memref<1x256xf32, #tpu.memory_space<vmem>>, vector<1x256xf32>,
    %54 = arith.mulf %43, %51 : vector<1x256xf32>
    %c0_18 = arith.constant 0 : index
    %c0_19 = arith.constant 0 : index
    %55 = vector.load %arg6[%c0_18, %c0_19] : memref<1x256xf32, #tpu.memory_space<vmem>>, vector<1x256xf32>
    tpu.vector_store %arg6[%c0_18, %c0_19], %54 {strides = array<i32>} : memref<1x256xf32, #tpu.memory_space<vmem>>, vector<1x256xf32>,
    return
  }
  func.func @transform_0(%arg0: i32) -> (i32, i32) {
    %c0_i32 = arith.constant 0 : i32
    %c0_i32_0 = arith.constant 0 : i32
    return %arg0, %c0_i32 : i32, i32
  }
  func.func @transform_1(%arg0: i32) -> (i32, i32) {
    %c0_i32 = arith.constant 0 : i32
    %c0_i32_0 = arith.constant 0 : i32
    %c0_i32_1 = arith.constant 0 : i32
    return %c0_i32, %c0_i32_0 : i32, i32
  }
  func.func @transform_2(%arg0: i32) -> (i32, i32) {
    %c0_i32 = arith.constant 0 : i32
    %c0_i32_0 = arith.constant 0 : i32
    %c0_i32_1 = arith.constant 0 : i32
    return %c0_i32, %c0_i32_0 : i32, i32
  }
  func.func @transform_3(%arg0: i32) -> (i32, i32) {
    %c0_i32 = arith.constant 0 : i32
    %c0_i32_0 = arith.constant 0 : i32
    return %c0_i32, %arg0 : i32, i32
  }
  func.func @transform_4(%arg0: i32) -> (i32, i32) {
    %c0_i32 = arith.constant 0 : i32
    %c0_i32_0 = arith.constant 0 : i32
    return %c0_i32, %arg0 : i32, i32
  }
  func.func @transform_5(%arg0: i32) -> (i32, i32) {
    %c0_i32 = arith.constant 0 : i32
    %c0_i32_0 = arith.constant 0 : i32
    return %c0_i32, %arg0 : i32, i32
  }
}

</mosaic_0001>

<bundles_post_ra>
// kernel: tpu_custom_call.1
= control target key start
LH: loop header
LB: loop body
LE: loop exit
PB: predicated region body
PF: predicated region fallthrough
CT: control target
= control target key end

     0   :  { %11 = vsyncpa [#allocation3], 0  ;;  %vm157_vm0 = vcmask 261120   ;;  %s2016_s0 = inlined_call_operand.vmem [shape: bf16[256,32], index: 0, kind: input, shape index: {}]   ;;  %s2017_s1 = inlined_call_operand.vmem [shape: bf16[32,128], index: 1, kind: input, shape index: {}]   ;;  %s2018_s2 = inlined_call_operand.vmem [shape: f32[1,128], index: 2, kind: input, shape index: {}]   ;;  %s2019_s3 = inlined_call_operand.vmem [shape: s32[1,256], index: 3, kind: input, shape index: {}]   ;;  %s2020_s4 = inlined_call_operand.hbm [shape: f32[1,256], index: 4, kind: output, shape index: {0}]   ;;  %s2021_s5 = inlined_call_operand.hbm [shape: f32[1,256], index: 5, kind: output, shape index: {1}]  }
   0x1   :  { %v1152_v0 = vld [vmem:[%s2017_s1 + $0x8] sm:$0xff]   ;;  %v1153_v1 = vld [vmem:[%s2017_s1] sm:$0xff]   ;;  %v1158_v6 = vld [vmem:[%s2016_s0 + $0x10] sm:$0xff]  }
   0x2   :  { %1056 = vmatprep.subr.bf16.mxu0 %v1152_v0  ;;  %1092 = vmatprep.subr.bf16.mxu1 %v1152_v0  ;;  %v1154_v2 = vld [vmem:[%s2016_s0] sm:$0xff]   ;;  %v1156_v4 = vld [vmem:[%s2016_s0 + $0x8] sm:$0xff]   ;;  %v1159_v7 = vld [vmem:[%s2016_s0 + $0x50] sm:$0xff]  }
   0x3   :  { %1057 = vmatpush3.bf16.msra.mxu0 %v1152_v0  ;;  %1094 = vmatpush3.bf16.msra.mxu1 %v1152_v0  ;;  %v1155_v3 = vld [vmem:[%s2016_s0 + $0x40] sm:$0xff]   ;;  %v1157_v5 = vld [vmem:[%s2016_s0 + $0x48] sm:$0xff]   ;;  %v1160_v8 = vld [vmem:[%s2016_s0 + $0x18] sm:$0xff]  }
   0x4   :  { %1058 = vmatprep.subr.bf16.mxu0 %v1153_v1  ;;  %1093 = vmatprep.subr.bf16.mxu1 %v1153_v1  ;;  %v1161_v9 = vld [vmem:[%s2016_s0 + $0x58] sm:$0xff]   ;;  %v1162_v10 = vld [vmem:[%s2016_s0 + $0x20] sm:$0xff]  }
   0x5   :  { %1060 = vmatprep.mubr.msk.bf16.mxu0 %vm157_vm0, %v1154_v2  ;;  %1076 = vmatprep.mubr.msk.bf16.mxu1 %vm157_vm0, %v1155_v3  ;;  %v1163_v11 = vld [vmem:[%s2016_s0 + $0x60] sm:$0xff]  }
   0x7   :  { %1059 = vmatpush3.bf16.msra.mxu0 %v1153_v1  ;;  %1095 = vmatpush3.bf16.msra.mxu1 %v1153_v1 }
   0xa   :  { %1061 = vmatmul.mubr.msk.bf16.vlgmr.msra.gmra.mxu0 %vm157_vm0, %v1156_v4  ;;  %1077 = vmatmul.mubr.msk.bf16.vlgmr.msra.gmra.mxu1 %vm157_vm0, %v1157_v5 }
   0xb   :  { %1064 = vmatprep.mubr.msk.bf16.mxu0 %vm157_vm0, %v1158_v6  ;;  %1080 = vmatprep.mubr.msk.bf16.mxu1 %vm157_vm0, %v1159_v7 }
  0x12   :  { %1065 = vmatmul.mubr.msk.bf16.gmra.mxu0 %vm157_vm0, %v1160_v8  ;;  %1081 = vmatmul.mubr.msk.bf16.gmra.mxu1 %vm157_vm0, %v1161_v9 }
  0x13   :  { %12 = vsyncpa [#allocation5], 0  ;;  %1068 = vmatprep.mubr.msk.bf16.mxu0 %vm157_vm0, %v1162_v10  ;;  %1084 = vmatprep.mubr.msk.bf16.mxu1 %vm157_vm0, %v1163_v11  ;;  %v1164_v12 = vld [vmem:[%s2016_s0 + $0x28] sm:$0xff]   ;;  %v1166_v14 = vld [vmem:[%s2016_s0 + $0x30] sm:$0xff]  }
  0x14   :  { %v1165_v13 = vld [vmem:[%s2016_s0 + $0x68] sm:$0xff]   ;;  %v1167_v15 = vld [vmem:[%s2016_s0 + $0x70] sm:$0xff]   ;;  %v1168_v16 = vld [vmem:[%s2016_s0 + $0x38] sm:$0xff]  }
  0x15   :  { %v1169_v17 = vld [vmem:[%s2016_s0 + $0x78] sm:$0xff]   ;;  %v1401_v20 = vld [vmem:[%s2018_s2] ss:$0 sm:$0xff] }
  0x1a   :  { %1069 = vmatmul.mubr.msk.bf16.gmra.mxu0 %vm157_vm0, %v1164_v12  ;;  %1085 = vmatmul.mubr.msk.bf16.gmra.mxu1 %vm157_vm0, %v1165_v13 }
  0x1b   :  { %1072 = vmatprep.mubr.msk.bf16.mxu0 %vm157_vm0, %v1166_v14  ;;  %1088 = vmatprep.mubr.msk.bf16.mxu1 %vm157_vm0, %v1167_v15 }
  0x22   :  { %1073 = vmatmul.mubr.msk.bf16.gmra.mxu0 %vm157_vm0, %v1168_v16  ;;  %1089 = vmatmul.mubr.msk.bf16.gmra.mxu1 %vm157_vm0, %v1169_v17 }
  0xca   :  { %v1062_v18 = vpop.f32.mrf.mxu0  ;;  %v1078_v19 = vpop.f32.mrf.mxu1 }
  0xcb   :  { %v249_v33 = vadd.f32 %v1062_v18, %v1401_v20  ;;  %v313_v34 = vadd.f32 %v1078_v19, %v1401_v20  ;;  %v2022_v19 = vlaneseq }
  0xcc   :  { %v240_v21 = vpop.f32.mrf.mxu0  ;;  %v304_v22 = vpop.f32.mrf.mxu1 }
  0xcd   :  { %v305_v23 = vadd.f32 %v1401_v20, %v304_v22  ;;  %v241_v24 = vadd.f32 %v1401_v20, %v240_v21 }
  0xce   :  { %v1063_v25 = vpop.f32.mrf.mxu0  ;;  %v1079_v26 = vpop.f32.mrf.mxu1 }
  0xcf   :  { %399 = vxpose.xlu1.b32.start [1/16] %v305_v23, 128  ;;  %367 = vxpose.xlu0.b32.start [1/16] %v241_v24, 128  ;;  %v252_v37 = vadd.f32 %v1063_v25, %v1401_v20  ;;  %v316_v38 = vadd.f32 %v1079_v26, %v1401_v20  ;;  %v1440_v23 = vshrl.u32 %v2022_v19, 7 }
  0xd0   :  { %v243_v27 = vpop.f32.mrf.mxu0  ;;  %v307_v28 = vpop.f32.mrf.mxu1 }
  0xd1   :  { %v244_v29 = vadd.f32 %v1401_v20, %v243_v27  ;;  %v308_v30 = vadd.f32 %v1401_v20, %v307_v28  ;;  %v641_v26 = vsub.s32 1, %v1440_v23  ;;  %v1453_v27 = vadd.s32 8, %v1440_v23 }
  0xd2   :  { %v1066_v31 = vpop.f32.mrf.mxu0  ;;  %v1082_v32 = vpop.f32.mrf.mxu1 }
  0xd3   :  { %400 = vxpose.xlu1.b32.cont [2/16] %v308_v30, 128  ;;  %368 = vxpose.xlu0.b32.cont [2/16] %v244_v29, 128  ;;  %v265_v49 = vadd.f32 %v1066_v31, %v1401_v20  ;;  %v329_v50 = vadd.f32 %v1082_v32, %v1401_v20  ;;  %v1463_v31 = vadd.s32 16, %v1440_v23  ;;  %v1468_v32 = vadd.s32 24, %v1440_v23 }
  0xd4   :  { %v256_v35 = vpop.f32.mrf.mxu0  ;;  %v320_v36 = vpop.f32.mrf.mxu1 }
  0xd5   :  { %v257_v41 = vadd.f32 %v1401_v20, %v256_v35  ;;  %v321_v42 = vadd.f32 %v1401_v20, %v320_v36  ;;  %v1479_v35 = vadd.s32 32, %v1440_v23 }
  0xd6   :  { %v1067_v39 = vpop.f32.mrf.mxu0  ;;  %v1083_v40 = vpop.f32.mrf.mxu1 }
  0xd7   :  { %401 = vxpose.xlu1.b32.cont [3/16] %v313_v34, 128  ;;  %369 = vxpose.xlu0.b32.cont [3/16] %v249_v33, 128  ;;  %v268_v53 = vadd.f32 %v1067_v39, %v1401_v20  ;;  %v332_v54 = vadd.f32 %v1083_v40, %v1401_v20  ;;  %v1489_v39 = vadd.s32 40, %v1440_v23 }
  0xd8   :  { %v259_v43 = vpop.f32.mrf.mxu0  ;;  %v323_v44 = vpop.f32.mrf.mxu1 }
  0xd9   :  { %v260_v45 = vadd.f32 %v1401_v20, %v259_v43  ;;  %v324_v46 = vadd.f32 %v1401_v20, %v323_v44  ;;  %v1496_v43 = vadd.s32 48, %v1440_v23 }
  0xda   :  { %v1070_v47 = vpop.f32.mrf.mxu0  ;;  %v1086_v48 = vpop.f32.mrf.mxu1 }
  0xdb   :  { %402 = vxpose.xlu1.b32.cont [4/16] %v316_v38, 128  ;;  %370 = vxpose.xlu0.b32.cont [4/16] %v252_v37, 128  ;;  %v281_v1 = vadd.f32 %v1070_v47, %v1401_v20  ;;  %v345_v2 = vadd.f32 %v1086_v48, %v1401_v20 }
  0xdc   :  { %v272_v51 = vpop.f32.mrf.mxu0  ;;  %v336_v52 = vpop.f32.mrf.mxu1 }
  0xdd   :  { %v273_v57 = vadd.f32 %v1401_v20, %v272_v51  ;;  %v337_v58 = vadd.f32 %v1401_v20, %v336_v52 }
  0xde   :  { %v1071_v55 = vpop.f32.mrf.mxu0  ;;  %v1087_v56 = vpop.f32.mrf.mxu1 }
  0xdf   :  { %403 = vxpose.xlu1.b32.cont [5/16] %v321_v42, 128  ;;  %371 = vxpose.xlu0.b32.cont [5/16] %v257_v41, 128  ;;  %v284_v5 = vadd.f32 %v1071_v55, %v1401_v20  ;;  %v348_v6 = vadd.f32 %v1087_v56, %v1401_v20 }
  0xe0   :  { %v275_v59 = vpop.f32.mrf.mxu0  ;;  %v339_v60 = vpop.f32.mrf.mxu1 }
  0xe1   :  { %v276_v61 = vadd.f32 %v1401_v20, %v275_v59  ;;  %v340_v62 = vadd.f32 %v1401_v20, %v339_v60 }
  0xe2   :  { %v1074_v63 = vpop.f32.mrf.mxu0  ;;  %v1090_v0 = vpop.f32.mrf.mxu1 }
  0xe3   :  { %404 = vxpose.xlu1.b32.cont [6/16] %v324_v46, 128  ;;  %372 = vxpose.xlu0.b32.cont [6/16] %v260_v45, 128  ;;  %v297_v15 = vadd.f32 %v1074_v63, %v1401_v20  ;;  %v361_v16 = vadd.f32 %v1090_v0, %v1401_v20  ;;  %v1530_v63 = vadd.s32 72, %v1440_v23 }
  0xe4   :  { %v288_v3 = vpop.f32.mrf.mxu0  ;;  %v352_v4 = vpop.f32.mrf.mxu1 }
  0xe5   :  { %v289_v9 = vadd.f32 %v1401_v20, %v288_v3  ;;  %v353_v10 = vadd.f32 %v1401_v20, %v352_v4  ;;  %v1540_v4 = vadd.s32 80, %v1440_v23 }
  0xe6   :  { %v1075_v7 = vpop.f32.mrf.mxu0  ;;  %v1091_v8 = vpop.f32.mrf.mxu1 }
  0xe7   :  { %405 = vxpose.xlu1.b32.cont [7/16] %v329_v50, 128  ;;  %373 = vxpose.xlu0.b32.cont [7/16] %v265_v49, 128  ;;  %v300_v17 = vadd.f32 %v1075_v7, %v1401_v20  ;;  %v364_v18 = vadd.f32 %v1091_v8, %v1401_v20  ;;  %v1509_v50 = vadd.s32 56, %v1440_v23 }
  0xe8   :  { %v291_v11 = vpop.f32.mrf.mxu0  ;;  %v355_v12 = vpop.f32.mrf.mxu1 }
  0xe9   :  { %v292_v13 = vadd.f32 %v1401_v20, %v291_v11  ;;  %v356_v14 = vadd.f32 %v1401_v20, %v355_v12  ;;  %v1450_v20 = vld [vmem:[%s2019_s3] sm:$0x3]  ;;  %s1296_s3 = smov [#allocation4]  }
  0xea   :  { %v1460_v30 = vrot.slane %v1450_v20, %v641_v26  ;;  %v1570_v26 = vadd.s32 104, %v1440_v23  ;;  %s988_s29 = sshll.u32 %s1296_s3, 4  ;;  %s989_s29 = int_to_ptr.vmem [resolvable:$true] %s988_s29 }
  0xeb   :  { %406 = vxpose.xlu1.b32.cont [8/16] %v332_v54, 128  ;;  %374 = vxpose.xlu0.b32.cont [8/16] %v268_v53, 128  ;;  %s1250_s30 = scalar_lea.vmem %s989_s29, 32  ;;  %p1255_p1 = scmp.lt.s32.totalorder %s989_s29, %s989_s29 }
  0xec   :  { %2054 = vst [vmem:[#allocation8_spill] sm:$0xff] %v1460_v30  ;;  %vm646_vm1 = vcmp.eq.s32.totalorder %v1453_v27, %v1460_v30  ;;  %vm644_vm2 = vcmp.eq.s32.totalorder %v1440_v23, %v1460_v30  ;;  %vm648_vm3 = vcmp.eq.s32.totalorder %v1463_v31, %v1460_v30  ;;  %vm650_vm4 = vcmp.eq.s32.totalorder %v1468_v32, %v1460_v30  ;;  %p1251_p0 = scmp.ne.s32.totalorder %s989_s29, %s1250_s30  ;;  %p1256_p2 = scmp.lt.s32.totalorder %s1250_s30, %s1250_s30 }
  0xed   :  { %vm652_vm5 = vcmp.eq.s32.totalorder %v1479_v35, %v1460_v30  ;;  %vm654_vm6 = vcmp.eq.s32.totalorder %v1489_v39, %v1460_v30  ;;  %vm656_vm7 = vcmp.eq.s32.totalorder %v1496_v43, %v1460_v30  ;;  %vm658_vm8 = vcmp.eq.s32.totalorder %v1509_v50, %v1460_v30 }
  0xee   :  { %vm662_vm10 = vcmp.eq.s32.totalorder %v1530_v63, %v1460_v30  ;;  %vm664_vm11 = vcmp.eq.s32.totalorder %v1540_v4, %v1460_v30  ;;  %vm670_vm14 = vcmp.eq.s32.totalorder %v1570_v26, %v1460_v30  ;;  %p1257_p3 = por %p1256_p2, %p1255_p1 }
  0xef   :  { %407 = vxpose.xlu1.b32.cont [9/16] %v337_v58, 128  ;;  %375 = vxpose.xlu0.b32.cont [9/16] %v273_v57, 128  ;;  %v1520_v57 = vadd.s32 64, %v1440_v23 }
  0xf0   :  { %p1258_p4 = pnand %p1257_p3, %p1251_p0 }
  0xf1   :  { %vm660_vm9 = vcmp.eq.s32.totalorder %v1520_v57, %v1460_v30 }
  0xf3   :  { %408 = vxpose.xlu1.b32.cont [10/16] %v340_v62, 128  ;;  %376 = vxpose.xlu0.b32.cont [10/16] %v276_v61, 128 }
  0xf7   :  { %409 = vxpose.xlu1.b32.cont [11/16] %v345_v2, 128  ;;  %377 = vxpose.xlu0.b32.cont [11/16] %v281_v1, 128 }
  0xfb   :  { %410 = vxpose.xlu1.b32.cont [12/16] %v348_v6, 128  ;;  %378 = vxpose.xlu0.b32.cont [12/16] %v284_v5, 128 }
  0xff   :  { %411 = vxpose.xlu1.b32.cont [13/16] %v353_v10, 128  ;;  %379 = vxpose.xlu0.b32.cont [13/16] %v289_v9, 128  ;;  %v1550_v9 = vadd.s32 88, %v1440_v23 }
 0x101   :  { %vm666_vm12 = vcmp.eq.s32.totalorder %v1550_v9, %v1460_v30 }
 0x103   :  { %412 = vxpose.xlu1.b32.cont [14/16] %v356_v14, 128  ;;  %380 = vxpose.xlu0.b32.cont [14/16] %v292_v13, 128  ;;  %v1560_v14 = vadd.s32 96, %v1440_v23 }
 0x105   :  { %vm668_vm13 = vcmp.eq.s32.totalorder %v1560_v14, %v1460_v30 }
 0x107   :  { %413 = vxpose.xlu1.b32.cont [15/16] %v361_v16, 128  ;;  %381 = vxpose.xlu0.b32.cont [15/16] %v297_v15, 128 }
 0x10b   :  { %414 = vxpose.xlu1.b32.end [16/16] %v364_v18, 128  ;;  %382 = vxpose.xlu0.b32.end [16/16] %v300_v17, 128 }
 0x14b   :  { %v1435_v21 = vpop.trf.xlu1  ;;  %v1437_v22 = vpop.trf.xlu0 }
 0x14c   :  { %v676_v40 = vsel %vm644_vm2, %v1435_v21, 0.0 }
 0x14f   :  { %v1442_v24 = vpop.trf.xlu1  ;;  %v1444_v25 = vpop.trf.xlu0 }
 0x150   :  { %v678_v36 = vsel %vm646_vm1, %v1442_v24, 0.0 }
 0x151   :  { %v728_v42 = vadd.f32 %v678_v36, %v676_v40 }
 0x153   :  { %v1455_v28 = vpop.trf.xlu1  ;;  %v1457_v29 = vpop.trf.xlu0 }
 0x154   :  { %v680_v41 = vsel %vm648_vm3, %v1455_v28, 0.0  ;;  %v453_v36 = vmax.f32 %v1435_v21, %v1455_v28 }
 0x155   :  { %v729_v45 = vadd.f32 %v728_v42, %v680_v41  ;;  %v432_v42 = vmax.f32 %v1437_v22, %v1457_v29 }
 0x157   :  { %v1470_v33 = vpop.trf.xlu1  ;;  %v1472_v34 = vpop.trf.xlu0 }
 0x158   :  { %v682_v44 = vsel %vm650_vm4, %v1470_v33, 0.0 }
 0x159   :  { %v730_v49 = vadd.f32 %v729_v45, %v682_v44  ;;  %v454_v44 = vmax.f32 %v1442_v24, %v1470_v33  ;;  %v433_v45 = vmax.f32 %v1444_v25, %v1472_v34 }
 0x15b   :  { %v1484_v37 = vpop.trf.xlu1  ;;  %v1486_v38 = vpop.trf.xlu0 }
 0x15c   :  { %v684_v48 = vsel %vm652_vm5, %v1484_v37, 0.0 }
 0x15d   :  { %v731_v52 = vadd.f32 %v730_v49, %v684_v48  ;;  %v455_v49 = vmax.f32 %v453_v36, %v1484_v37 }
 0x15f   :  { %v1501_v46 = vpop.trf.xlu1  ;;  %v1503_v47 = vpop.trf.xlu0 }
 0x160   :  { %2055 = vst [vmem:[#allocation9_spill] sm:$0xff] %v1503_v47  ;;  %v686_v51 = vsel %vm654_vm6, %v1501_v46, 0.0 }
 0x161   :  { %v732_v56 = vadd.f32 %v731_v52, %v686_v51  ;;  %v1589_v52 = vadd.s32 112, %v1440_v23 }
 0x163   :  { %v1512_v53 = vpop.trf.xlu1  ;;  %v1514_v54 = vpop.trf.xlu0  ;;  %vm672_vm15 = vcmp.eq.s32.totalorder %v1589_v52, %v1460_v30 }
 0x164   :  { %2056 = vst [vmem:[#allocation10_spill] sm:$0xff] %v1514_v54  ;;  %v688_v55 = vsel %vm656_vm7, %v1512_v53, 0.0 }
 0x165   :  { %v733_v58 = vadd.f32 %v732_v56, %v688_v55  ;;  %v434_v55 = vmax.f32 %v432_v42, %v1486_v38  ;;  %v456_v56 = vmax.f32 %v454_v44, %v1501_v46 }
 0x167   :  { %v1522_v59 = vpop.trf.xlu1  ;;  %v1524_v60 = vpop.trf.xlu0 }
 0x168   :  { %2057 = vst [vmem:[#allocation11_spill] sm:$0xff] %v1524_v60  ;;  %v690_v61 = vsel %vm658_vm8, %v1522_v59, 0.0 }
 0x169   :  { %v734_v62 = vadd.f32 %v733_v58, %v690_v61  ;;  %v435_v58 = vmax.f32 %v433_v45, %v1503_v47  ;;  %v457_v61 = vmax.f32 %v455_v49, %v1512_v53  ;;  %v637_v45 = vsub.s32 0, %v1440_v23 }
 0x16b   :  { %v1532_v0 = vpop.trf.xlu1  ;;  %v1534_v1 = vpop.trf.xlu0 }
 0x16c   :  { %2058 = vst [vmem:[#allocation12_spill] sm:$0xff] %v1534_v1  ;;  %v692_v2 = vsel %vm660_vm9, %v1532_v0, 0.0 }
 0x16d   :  { %v735_v3 = vadd.f32 %v734_v62, %v692_v2 }
 0x16f   :  { %v1542_v5 = vpop.trf.xlu1  ;;  %v1544_v6 = vpop.trf.xlu0 }
 0x170   :  { %2059 = vst [vmem:[#allocation13_spill] sm:$0xff] %v1544_v6  ;;  %v694_v7 = vsel %vm662_vm10, %v1542_v5, 0.0 }
 0x171   :  { %v736_v8 = vadd.f32 %v735_v3, %v694_v7  ;;  %v436_v3 = vmax.f32 %v434_v55, %v1514_v54  ;;  %v458_v7 = vmax.f32 %v456_v56, %v1522_v59 }
 0x173   :  { %v1552_v10 = vpop.trf.xlu1  ;;  %v1554_v11 = vpop.trf.xlu0  ;;  %v438_v36 = vmax.f32 %v436_v3, %v1534_v1  ;;  %v460_v42 = vmax.f32 %v458_v7, %v1542_v5 }
 0x174   :  { %2060 = vst [vmem:[#allocation14_spill] sm:$0xff] %v1554_v11  ;;  %v696_v12 = vsel %vm664_vm11, %v1552_v10, 0.0 }
 0x175   :  { %v737_v13 = vadd.f32 %v736_v8, %v696_v12  ;;  %v437_v8 = vmax.f32 %v435_v58, %v1524_v60 }
 0x177   :  { %v1562_v15 = vpop.trf.xlu1  ;;  %v1564_v16 = vpop.trf.xlu0  ;;  %v439_v44 = vmax.f32 %v437_v8, %v1544_v6 }
 0x178   :  { %2061 = vst [vmem:[#allocation15_spill] sm:$0xff] %v1564_v16  ;;  %v698_v17 = vsel %vm666_vm12, %v1562_v15, 0.0  ;;  %v462_v56 = vmax.f32 %v460_v42, %v1562_v15 }
 0x179   :  { %v738_v18 = vadd.f32 %v737_v13, %v698_v17  ;;  %v459_v13 = vmax.f32 %v457_v61, %v1532_v0  ;;  %v441_v58 = vmax.f32 %v439_v44, %v1564_v16 }
 0x17b   :  { %v1574_v40 = vpop.trf.xlu1  ;;  %v1576_v41 = vpop.trf.xlu0 }
 0x17c   :  { %2062 = vst [vmem:[#allocation16_spill] sm:$0xff] %v1576_v41  ;;  %v700_v48 = vsel %vm668_vm13, %v1574_v40, 0.0 }
 0x17d   :  { %v739_v51 = vadd.f32 %v738_v18, %v700_v48  ;;  %v1607_v18 = vadd.s32 120, %v1440_v23  ;;  %v461_v48 = vmax.f32 %v459_v13, %v1552_v10 }
 0x17f   :  { %v1595_v62 = vpop.trf.xlu1  ;;  %v1597_v2 = vpop.trf.xlu0  ;;  %2064 = vst [vmem:[#allocation18_spill] sm:$0xff] %v1607_v18  ;;  %v463_v3 = vmax.f32 %v461_v48, %v1574_v40  ;;  %vm674_vm0 = vcmp.eq.s32.totalorder %v1607_v18, %v1460_v30 }
 0x180   :  { %2063 = vst [vmem:[#allocation17_spill] sm:$0xff] %v1597_v2  ;;  %v702_v12 = vsel %vm670_vm14, %v1595_v62, 0.0  ;;  %v443_v13 = vmax.f32 %v441_v58, %v1597_v2 }
 0x181   :  { %v740_v17 = vadd.f32 %v739_v51, %v702_v12  ;;  %v440_v51 = vmax.f32 %v438_v36, %v1554_v11  ;;  %v464_v12 = vmax.f32 %v462_v56, %v1595_v62  ;;  %v1629_v36 = vrot.slane %v1450_v20, %v637_v45 }
 0x183   :  { %v1614_v49 = vpop.trf.xlu1  ;;  %v1616_v55 = vpop.trf.xlu0  ;;  %v442_v8 = vmax.f32 %v440_v51, %v1576_v41  ;;  %2066 = vst [vmem:[#allocation20_spill] sm:$0xff] %v1629_v36  ;;  %vm645_vm1 = vcmp.eq.s32.totalorder %v1453_v27, %v1629_v36  ;;  %vm643_vm2 = vcmp.eq.s32.totalorder %v1440_v23, %v1629_v36  ;;  %vm647_vm3 = vcmp.eq.s32.totalorder %v1463_v31, %v1629_v36 }
 0x184   :  { %2065 = vst [vmem:[#allocation19_spill] sm:$0xff] %v1616_v55  ;;  %v704_v61 = vsel %vm672_vm15, %v1614_v49, 0.0  ;;  %v465_v42 = vmax.f32 %v463_v3, %v1614_v49  ;;  %v677_v58 = vsel %vm645_vm1, %v1444_v25, 0.0  ;;  %vm649_vm4 = vcmp.eq.s32.totalorder %v1468_v32, %v1629_v36 }
 0x185   :  { %v741_v7 = vadd.f32 %v740_v17, %v704_v61  ;;  %v444_v48 = vmax.f32 %v442_v8, %v1616_v55  ;;  %v675_v8 = vsel %vm643_vm2, %v1437_v22, 0.0  ;;  %vm651_vm5 = vcmp.eq.s32.totalorder %v1479_v35, %v1629_v36 }
 0x186   :  { %vm653_vm6 = vcmp.eq.s32.totalorder %v1489_v39, %v1629_v36  ;;  %vm655_vm7 = vcmp.eq.s32.totalorder %v1496_v43, %v1629_v36  ;;  %vm657_vm8 = vcmp.eq.s32.totalorder %v1509_v50, %v1629_v36 }
 0x187   :  { %v1632_v44 = vpop.trf.xlu1  ;;  %v1634_v19 = vpop.trf.xlu0 }
 0x188   :  { %2067 = vst [vmem:[#allocation21_spill] sm:$0xff] %v1634_v19  ;;  %v466_v30 = vmax.f32 %v464_v12, %v1632_v44  ;;  %v706_v17 = vsel %vm674_vm0, %v1632_v44, 0.0  ;;  %v445_v51 = vmax.f32 %v443_v13, %v1634_v19  ;;  %v707_v13 = vadd.f32 %v677_v58, %v675_v8 }
 0x189   :  { %v1642_v56 = vadd.f32 %v741_v7, %v706_v17  ;;  %v679_v7 = vsel %vm647_vm3, %v1457_v29, 0.0  ;;  %v683_v19 = vsel %vm651_vm5, %v1486_v38, 0.0 }
 0x18a   :  { %v467_v20 = vmax.f32 %v465_v42, %v466_v30  ;;  %v446_v45 = vmax.f32 %v444_v48, %v445_v51  ;;  %v681_v42 = vsel %vm649_vm4, %v1472_v34, 0.0  ;;  %v708_v51 = vadd.f32 %v707_v13, %v679_v7 }
 0x18b   :  { %2068 = vst [vmem:[#allocation22_spill] sm:$0xff] %v1642_v56  ;;  %v689_v13 = vsel %vm657_vm8, %v1524_v60, 0.0 }
 0x18c   :  { %v468_v61 = vrot.slane %v467_v20, 4  ;;  %v447_v3 = vrot.slane %v446_v45, 4  ;;  %v709_v2 = vadd.f32 %v708_v51, %v681_v42 }
 0x18e   :  { %v469_v12 = vmax.f32 %v467_v20, %v468_v61  ;;  %v448_v30 = vmax.f32 %v446_v45, %v447_v3  ;;  %v685_v20 = vsel %vm653_vm6, %v1503_v47, 0.0  ;;  %v710_v61 = vadd.f32 %v709_v2, %v683_v19 }
 0x18f   :  { %v687_v3 = vsel %vm655_vm7, %v1514_v54, 0.0 }
 0x190   :  { %v470_v48 = vrot.slane %v469_v12, 2  ;;  %v449_v17 = vrot.slane %v448_v30, 2  ;;  %v711_v7 = vadd.f32 %v710_v61, %v685_v20 }
 0x192   :  { %v471_v55 = vmax.f32 %v469_v12, %v470_v48  ;;  %v450_v58 = vmax.f32 %v448_v30, %v449_v17  ;;  %v712_v51 = vadd.f32 %v711_v7, %v687_v3 }
 0x194   :  { %v472_v45 = vrot.slane %v471_v55, 1  ;;  %v451_v48 = vrot.slane %v450_v58, 1  ;;  %v1674_v2 = vadd.f32 %v712_v51, %v689_v13 }
 0x196   :  { %v1665_v8 = vmax.f32 %v471_v55, %v472_v45  ;;  %2070 = vst [vmem:[#allocation24_spill] sm:$0xff] %v1674_v2  ;;  %v1681_v61 = vmax.f32 %v450_v58, %v451_v48 }
 0x198   :  { %2069 = vst [vmem:[#allocation23_spill] sm:$0xff] %v1665_v8  ;;  %v475_v12 = vsub.f32 %v1435_v21, %v1665_v8  ;;  %v477_v42 = vsub.f32 %v1442_v24, %v1665_v8  ;;  %v479_v19 = vsub.f32 %v1455_v28, %v1665_v8  ;;  %v481_v55 = vsub.f32 %v1470_v33, %v1665_v8 }
 0x199   :  { %v483_v17 = vsub.f32 %v1484_v37, %v1665_v8  ;;  %v485_v3 = vsub.f32 %v1501_v46, %v1665_v8  ;;  %v487_v7 = vsub.f32 %v1512_v53, %v1665_v8  ;;  %v489_v13 = vsub.f32 %v1522_v59, %v1665_v8 }
 0x19a   :  { %v508_v20 = vmul.f32 1.442695, %v475_v12  ;;  %v512_v45 = vmul.f32 1.442695, %v477_v42  ;;  %v516_v51 = vmul.f32 1.442695, %v479_v19  ;;  %v491_v30 = vsub.f32 %v1532_v0, %v1665_v8 }
 0x19b   :  { %v493_v2 = vsub.f32 %v1542_v5, %v1665_v8  ;;  %v495_v58 = vsub.f32 %v1552_v10, %v1665_v8  ;;  %v497_v12 = vsub.f32 %v1562_v15, %v1665_v8  ;;  %v499_v42 = vsub.f32 %v1574_v40, %v1665_v8 }
 0x19c   :  { %1170 = vpow2.f32 %v508_v20  ;;  %v520_v48 = vmul.f32 1.442695, %v481_v55  ;;  %v501_v19 = vsub.f32 %v1595_v62, %v1665_v8  ;;  %v503_v36 = vsub.f32 %v1614_v49, %v1665_v8 }
 0x19d   :  { %1172 = vpow2.f32 %v512_v45  ;;  %v505_v56 = vsub.f32 %v1632_v44, %v1665_v8  ;;  %v524_v41 = vmul.f32 1.442695, %v483_v17  ;;  %v528_v20 = vmul.f32 1.442695, %v485_v3 }
 0x19e   :  { %1174 = vpow2.f32 %v516_v51  ;;  %v532_v16 = vmul.f32 1.442695, %v487_v7  ;;  %vm766_vm9 = vcmp.eq.f32.partialorder %v1435_v21, %v1665_v8  ;;  %v536_v11 = vmul.f32 1.442695, %v489_v13 }
 0x19f   :  { %v540_v6 = vmul.f32 1.442695, %v491_v30  ;;  %v544_v45 = vmul.f32 1.442695, %v493_v2  ;;  %vm768_vm10 = vcmp.eq.f32.partialorder %v1442_v24, %v1665_v8  ;;  %1176 = vpow2.f32 %v520_v48 }
 0x1a0   :  { %v548_v55 = vmul.f32 1.442695, %v495_v58  ;;  %v552_v1 = vmul.f32 1.442695, %v497_v12  ;;  %v556_v60 = vmul.f32 1.442695, %v499_v42  ;;  %1178 = vpow2.f32 %v524_v41 }
 0x1a1   :  { %v560_v54 = vmul.f32 1.442695, %v501_v19  ;;  %v1709_v47 = vmul.f32 1.442695, %v503_v36  ;;  %v1711_v17 = vmul.f32 1.442695, %v505_v56  ;;  %1180 = vpow2.f32 %v528_v20 }
 0x1a2   :  { %vm770_vm11 = vcmp.eq.f32.partialorder %v1455_v28, %v1665_v8  ;;  %vm772_vm12 = vcmp.eq.f32.partialorder %v1470_v33, %v1665_v8  ;;  %vm774_vm13 = vcmp.eq.f32.partialorder %v1484_v37, %v1665_v8  ;;  %1182 = vpow2.f32 %v532_v16 }
 0x1a3   :  { %vm776_vm14 = vcmp.eq.f32.partialorder %v1501_v46, %v1665_v8  ;;  %vm778_vm15 = vcmp.eq.f32.partialorder %v1512_v53, %v1665_v8  ;;  %vm780_vm0 = vcmp.eq.f32.partialorder %v1522_v59, %v1665_v8  ;;  %1184 = vpow2.f32 %v536_v11 }
 0x1a4   :  { %vm782_vm1 = vcmp.eq.f32.partialorder %v1532_v0, %v1665_v8  ;;  %vm784_vm2 = vcmp.eq.f32.partialorder %v1542_v5, %v1665_v8  ;;  %vm786_vm3 = vcmp.eq.f32.partialorder %v1552_v10, %v1665_v8  ;;  %v798_v28 = vsel %vm766_vm9, %v1440_v23, 128 }
 0x1a5   :  { %v800_v33 = vsel %vm768_vm10, %v1453_v27, 128  ;;  %v802_v11 = vsel %vm770_vm11, %v1463_v31, 128  ;;  %v804_v16 = vsel %vm772_vm12, %v1468_v32, 128  ;;  %1186 = vpow2.f32 %v540_v6 }
 0x1a6   :  { %vm788_vm4 = vcmp.eq.f32.partialorder %v1562_v15, %v1665_v8  ;;  %vm790_vm5 = vcmp.eq.f32.partialorder %v1574_v40, %v1665_v8  ;;  %vm792_vm6 = vcmp.eq.f32.partialorder %v1595_v62, %v1665_v8  ;;  %1188 = vpow2.f32 %v544_v45 }
 0x1a7   :  { %vm794_vm7 = vcmp.eq.f32.partialorder %v1614_v49, %v1665_v8  ;;  %v806_v21 = vsel %vm774_vm13, %v1479_v35, 128  ;;  %v808_v24 = vsel %vm776_vm14, %v1489_v39, 128  ;;  %1190 = vpow2.f32 %v548_v55 }
 0x1a8   :  { %vm796_vm8 = vcmp.eq.f32.partialorder %v1632_v44, %v1665_v8  ;;  %v810_v41 = vsel %vm778_vm15, %v1496_v43, 128  ;;  %vm868_vm9 = vcmp.lt.s32.totalorder %v798_v28, %v802_v11  ;;  %vm870_vm10 = vcmp.lt.s32.totalorder %v800_v33, %v804_v16 }
 0x1a9   :  { %v1171_v6 = vpop.eup %1170  ;;  %v812_v37 = vsel %vm780_vm0, %v1509_v50, 128  ;;  %v814_v46 = vsel %vm782_vm1, %v1520_v57, 128  ;;  %v869_v56 = vsel %vm868_vm9, %v798_v28, %v802_v11  ;;  %v871_v2 = vsel %vm870_vm10, %v800_v33, %v804_v16 }
 0x1aa   :  { %v1173_v36 = vpop.eup %1172  ;;  %1192 = vpow2.f32 %v552_v1  ;;  %vm872_vm11 = vcmp.lt.s32.totalorder %v869_v56, %v806_v21  ;;  %vm874_vm12 = vcmp.lt.s32.totalorder %v871_v2, %v808_v24  ;;  %v816_v3 = vsel %vm784_vm2, %v1530_v63, 128 }
 0x1ab   :  { %v591_v30 = vadd.f32 %v1173_v36, %v1171_v6  ;;  %v1175_v53 = vpop.eup %1174  ;;  %v818_v59 = vsel %vm786_vm3, %v1540_v4, 128  ;;  %v873_v7 = vsel %vm872_vm11, %v869_v56, %v806_v21  ;;  %v875_v0 = vsel %vm874_vm12, %v871_v2, %v808_v24 }
 0x1ac   :  { %v820_v1 = vsel %vm788_vm4, %v1550_v9, 128  ;;  %vm876_vm13 = vcmp.lt.s32.totalorder %v873_v7, %v810_v41  ;;  %vm878_vm14 = vcmp.lt.s32.totalorder %v875_v0, %v812_v37  ;;  %v1177_v51 = vpop.eup %1176  ;;  %1194 = vpow2.f32 %v556_v60 }
 0x1ad   :  { %v592_v13 = vadd.f32 %v1175_v53, %v591_v30  ;;  %v822_v5 = vsel %vm790_vm5, %v1560_v14, 128  ;;  %v877_v58 = vsel %vm876_vm13, %v873_v7, %v810_v41  ;;  %v879_v10 = vsel %vm878_vm14, %v875_v0, %v812_v37  ;;  %v1179_v12 = vpop.eup %1178  ;;  %v2071_v7 = vld [vmem:[#allocation9_spill] sm:$0xff] }
 0x1ae   :  { %v824_v48 = vsel %vm792_vm6, %v1570_v26, 128  ;;  %vm880_vm15 = vcmp.lt.s32.totalorder %v877_v58, %v814_v46  ;;  %vm882_vm0 = vcmp.lt.s32.totalorder %v879_v10, %v816_v3  ;;  %v1181_v15 = vpop.eup %1180  ;;  %1196 = vpow2.f32 %v560_v54 }
 0x1af   :  { %v593_v42 = vadd.f32 %v1177_v51, %v592_v13  ;;  %v826_v60 = vsel %vm794_vm7, %v1589_v52, 128  ;;  %v881_v40 = vsel %vm880_vm15, %v877_v58, %v814_v46  ;;  %v883_v19 = vsel %vm882_vm0, %v879_v10, %v816_v3  ;;  %v1183_v20 = vpop.eup %1182  ;;  %v2072_v13 = vld [vmem:[#allocation10_spill] sm:$0xff]  ;;  %v2073_v10 = vld [vmem:[#allocation11_spill] sm:$0xff] }
 0x1b0   :  { %1198 = vpow2.f32 %v1709_v47  ;;  %vm884_vm1 = vcmp.lt.s32.totalorder %v881_v40, %v818_v59  ;;  %vm886_vm2 = vcmp.lt.s32.totalorder %v883_v19, %v820_v1  ;;  %v1185_v55 = vpop.eup %1184  ;;  %v474_v33 = vsub.f32 %v1437_v22, %v1681_v61 }
 0x1b1   :  { %v594_v45 = vadd.f32 %v1179_v12, %v593_v42  ;;  %v885_v62 = vsel %vm884_vm1, %v881_v40, %v818_v59  ;;  %v887_v28 = vsel %vm886_vm2, %v883_v19, %v820_v1  ;;  %v476_v54 = vsub.f32 %v1444_v25, %v1681_v61  ;;  %v2074_v42 = vld [vmem:[#allocation12_spill] sm:$0xff]  ;;  %v2076_v40 = vld [vmem:[#allocation14_spill] sm:$0xff] }
 0x1b2   :  { %vm888_vm3 = vcmp.lt.s32.totalorder %v885_v62, %v822_v5  ;;  %vm890_vm4 = vcmp.lt.s32.totalorder %v887_v28, %v824_v48  ;;  %v478_v49 = vsub.f32 %v1457_v29, %v1681_v61  ;;  %v1187_v16 = vpop.eup %1186  ;;  %1200 = vpow2.f32 %v1711_v17 }
 0x1b3   :  { %v595_v11 = vadd.f32 %v1181_v15, %v594_v45  ;;  %v828_v47 = vsel %vm796_vm8, %v1607_v18, 128  ;;  %v889_v21 = vsel %vm888_vm3, %v885_v62, %v822_v5  ;;  %v891_v24 = vsel %vm890_vm4, %v887_v28, %v824_v48  ;;  %v1189_v6 = vpop.eup %1188  ;;  %v2075_v15 = vld [vmem:[#allocation13_spill] sm:$0xff]  ;;  %v2077_v28 = vld [vmem:[#allocation15_spill] sm:$0xff] }
 0x1b4   :  { %vm892_vm5 = vcmp.lt.s32.totalorder %v889_v21, %v826_v60  ;;  %vm894_vm6 = vcmp.lt.s32.totalorder %v891_v24, %v828_v47  ;;  %v480_v36 = vsub.f32 %v1472_v34, %v1681_v61  ;;  %v1191_v37 = vpop.eup %1190  ;;  %v506_v2 = vmul.f32 1.442695, %v474_v33 }
 0x1b5   :  { %v596_v41 = vadd.f32 %v1183_v20, %v595_v11  ;;  %v893_v46 = vsel %vm892_vm5, %v889_v21, %v826_v60  ;;  %v895_v56 = vsel %vm894_vm6, %v891_v24, %v828_v47  ;;  %v510_v30 = vmul.f32 1.442695, %v476_v54  ;;  %v2078_v54 = vld [vmem:[#allocation16_spill] sm:$0xff] }
 0x1b6   :  { %vm896_vm7 = vcmp.lt.s32.totalorder %v893_v46, %v895_v56  ;;  %v482_v44 = vsub.f32 %v1486_v38, %v1681_v61  ;;  %v514_v53 = vmul.f32 1.442695, %v478_v49  ;;  %v484_v0 = vsub.f32 %v2071_v7, %v1681_v61 }
 0x1b7   :  { %v597_v17 = vadd.f32 %v1185_v55, %v596_v41  ;;  %v1193_v3 = vpop.eup %1192  ;;  %v897_v59 = vsel %vm896_vm7, %v893_v46, %v895_v56  ;;  %v486_v1 = vsub.f32 %v2072_v13, %v1681_v61  ;;  %1202 = vpow2.f32 %v506_v2  ;;  %v2080_v46 = vld [vmem:[#allocation19_spill] sm:$0xff]  ;;  %v2081_v2 = vld [vmem:[#allocation21_spill] sm:$0xff] }
 0x1b8   :  { %v898_v5 = vrot.slane %v897_v59, 4  ;;  %1204 = vpow2.f32 %v510_v30  ;;  %v518_v58 = vmul.f32 1.442695, %v480_v36  ;;  %v488_v12 = vsub.f32 %v2073_v10, %v1681_v61  ;;  %v2079_v36 = vld [vmem:[#allocation17_spill] sm:$0xff] }
 0x1b9   :  { %v598_v51 = vadd.f32 %v1187_v16, %v597_v17  ;;  %v490_v48 = vsub.f32 %v2074_v42, %v1681_v61  ;;  %v492_v60 = vsub.f32 %v2075_v15, %v1681_v61  ;;  %v494_v19 = vsub.f32 %v2076_v40, %v1681_v61  ;;  %v1195_v20 = vpop.eup %1194 }
 0x1ba   :  { %vm899_vm8 = vcmp.lt.s32.totalorder %v897_v59, %v898_v5  ;;  %1206 = vpow2.f32 %v514_v53  ;;  %v522_v55 = vmul.f32 1.442695, %v482_v44  ;;  %v496_v33 = vsub.f32 %v2077_v28, %v1681_v61  ;;  %v2082_v53 = vld [vmem:[#allocation22_spill] sm:$0xff] }
 0x1bb   :  { %v599_v45 = vadd.f32 %v1189_v6, %v598_v51  ;;  %v900_v62 = vsel %vm899_vm8, %v897_v59, %v898_v5  ;;  %v498_v11 = vsub.f32 %v2078_v54, %v1681_v61  ;;  %v526_v49 = vmul.f32 1.442695, %v484_v0  ;;  %v1197_v16 = vpop.eup %1196 }
 0x1bc   :  { %v901_v21 = vrot.slane %v900_v62, 2  ;;  %1208 = vpow2.f32 %v518_v58  ;;  %v530_v24 = vmul.f32 1.442695, %v486_v1  ;;  %v500_v6 = vsub.f32 %v2079_v36, %v1681_v61 }
 0x1bd   :  { %v600_v47 = vadd.f32 %v1191_v37, %v599_v45  ;;  %v1199_v41 = vpop.eup %1198  ;;  %v502_v56 = vsub.f32 %v2080_v46, %v1681_v61  ;;  %v504_v30 = vsub.f32 %v2081_v2, %v1681_v61  ;;  %v534_v17 = vmul.f32 1.442695, %v488_v12 }
 0x1be   :  { %v2083_v59 = vrot.slane %v2082_v53, 4  ;;  %1210 = vpow2.f32 %v522_v55  ;;  %v538_v37 = vmul.f32 1.442695, %v490_v48  ;;  %v542_v1 = vmul.f32 1.442695, %v492_v60 }
 0x1bf   :  { %v601_v44 = vadd.f32 %v1193_v3, %v600_v47  ;;  %1212 = vpow2.f32 %v526_v49  ;;  %v546_v51 = vmul.f32 1.442695, %v494_v19  ;;  %v550_v5 = vmul.f32 1.442695, %v496_v33  ;;  %v1201_v58 = vpop.eup %1200 }
 0x1c0   :  { %v1836_v0 = vadd.f32 %v2083_v59, %v2082_v53  ;;  %vm902_vm9 = vcmp.lt.s32.totalorder %v900_v62, %v901_v21  ;;  %1214 = vpow2.f32 %v530_v24  ;;  %v554_v8 = vmul.f32 1.442695, %v498_v11 }
 0x1c1   :  { %v602_v45 = vadd.f32 %v1195_v20, %v601_v44  ;;  %1216 = vpow2.f32 %v534_v17  ;;  %v558_v18 = vmul.f32 1.442695, %v500_v6  ;;  %v562_v12 = vmul.f32 1.442695, %v502_v56 }
 0x1c2   :  { %v566_v3 = vmul.f32 1.442695, %v504_v30  ;;  %1218 = vpow2.f32 %v538_v37  ;;  %vm765_vm10 = vcmp.eq.f32.partialorder %v1437_v22, %v1681_v61  ;;  %vm767_vm11 = vcmp.eq.f32.partialorder %v1444_v25, %v1681_v61  ;;  %v2084_v22 = vld [vmem:[#allocation20_spill] sm:$0xff] }
 0x1c3   :  { %v603_v47 = vadd.f32 %v1197_v16, %v602_v45  ;;  %v1842_v48 = vsel %vm902_vm9, %v900_v62, %v901_v21  ;;  %1220 = vpow2.f32 %v542_v1  ;;  %vm769_vm12 = vcmp.eq.f32.partialorder %v1457_v29, %v1681_v61 }
 0x1c4   :  { %vm771_vm13 = vcmp.eq.f32.partialorder %v1472_v34, %v1681_v61  ;;  %v1203_v60 = vpop.eup %1202  ;;  %1222 = vpow2.f32 %v546_v51  ;;  %vm773_vm14 = vcmp.eq.f32.partialorder %v1486_v38, %v1681_v61  ;;  %vm775_vm15 = vcmp.eq.f32.partialorder %v2071_v7, %v1681_v61 }
 0x1c5   :  { %v604_v19 = vadd.f32 %v1199_v41, %v603_v47  ;;  %v1205_v20 = vpop.eup %1204  ;;  %1224 = vpow2.f32 %v550_v5  ;;  %vm777_vm0 = vcmp.eq.f32.partialorder %v2072_v13, %v1681_v61  ;;  %vm779_vm1 = vcmp.eq.f32.partialorder %v2073_v10, %v1681_v61 }
 0x1c6   :  { %vm781_vm2 = vcmp.eq.f32.partialorder %v2074_v42, %v1681_v61  ;;  %1226 = vpow2.f32 %v554_v8  ;;  %v570_v62 = vadd.f32 %v1205_v20, %v1203_v60  ;;  %vm783_vm3 = vcmp.eq.f32.partialorder %v2075_v15, %v1681_v61 }
 0x1c7   :  { %v605_v55 = vadd.f32 %v1201_v58, %v604_v19  ;;  %v1207_v33 = vpop.eup %1206  ;;  %1228 = vpow2.f32 %v558_v18  ;;  %vm785_vm4 = vcmp.eq.f32.partialorder %v2076_v40, %v1681_v61  ;;  %v797_v11 = vsel %vm765_vm10, %v1440_v23, 128 }
 0x1c8   :  { %v799_v49 = vsel %vm767_vm11, %v1453_v27, 128  ;;  %v571_v16 = vadd.f32 %v1207_v33, %v570_v62  ;;  %v801_v18 = vsel %vm769_vm12, %v1463_v31, 128  ;;  %v803_v21 = vsel %vm771_vm13, %v1468_v32, 128 }
 0x1c9   :  { %v606_v8 = vrot.slane %v605_v55, 4  ;;  %v1209_v24 = vpop.eup %1208  ;;  %1230 = vpow2.f32 %v562_v12  ;;  %vm787_vm5 = vcmp.eq.f32.partialorder %v2077_v28, %v1681_v61  ;;  %vm789_vm6 = vcmp.eq.f32.partialorder %v2078_v54, %v1681_v61 }
 0x1ca   :  { %vm791_vm7 = vcmp.eq.f32.partialorder %v2079_v36, %v1681_v61  ;;  %vm659_vm8 = vcmp.eq.s32.totalorder %v1520_v57, %v2084_v22  ;;  %1232 = vpow2.f32 %v566_v3  ;;  %v572_v27 = vadd.f32 %v1209_v24, %v571_v16 }
 0x1cb   :  { %v607_v25 = vadd.f32 %v606_v8, %v605_v55  ;;  %vm793_vm9 = vcmp.eq.f32.partialorder %v2080_v46, %v1681_v61  ;;  %v1211_v29 = vpop.eup %1210  ;;  %vm795_vm10 = vcmp.eq.f32.partialorder %v2081_v2, %v1681_v61  ;;  %v805_v31 = vsel %vm773_vm14, %v1479_v35, 128 }
 0x1cc   :  { %v807_v32 = vsel %vm775_vm15, %v1489_v39, 128  ;;  %vm829_vm11 = vcmp.lt.s32.totalorder %v797_v11, %v801_v18  ;;  %vm831_vm12 = vcmp.lt.s32.totalorder %v799_v49, %v803_v21  ;;  %v1213_v34 = vpop.eup %1212  ;;  %vm661_vm13 = vcmp.eq.s32.totalorder %v1530_v63, %v2084_v22 }
 0x1cd   :  { %v608_v41 = vrot.slane %v607_v25, 2  ;;  %v573_v6 = vadd.f32 %v1211_v29, %v572_v27  ;;  %v830_v56 = vsel %vm829_vm11, %v797_v11, %v801_v18  ;;  %v832_v30 = vsel %vm831_vm12, %v799_v49, %v803_v21  ;;  %v1215_v17 = vpop.eup %1214  ;;  %v2085_v27 = vld [vmem:[#allocation18_spill] sm:$0xff] }
 0x1ce   :  { %v809_v35 = vsel %vm777_vm0, %v1496_v43, 128  ;;  %v811_v38 = vsel %vm779_vm1, %v1509_v50, 128  ;;  %vm833_vm14 = vcmp.lt.s32.totalorder %v830_v56, %v805_v31  ;;  %vm835_vm15 = vcmp.lt.s32.totalorder %v832_v30, %v807_v32  ;;  %v1217_v39 = vpop.eup %1216 }
 0x1cf   :  { %v574_v7 = vadd.f32 %v1213_v34, %v573_v6  ;;  %v834_v44 = vsel %vm833_vm14, %v830_v56, %v805_v31  ;;  %v836_v53 = vsel %vm835_vm15, %v832_v30, %v807_v32  ;;  %v609_v59 = vadd.f32 %v608_v41, %v607_v25  ;;  %v1219_v37 = vpop.eup %1218 }
 0x1d0   :  { %vm663_vm11 = vcmp.eq.s32.totalorder %v1540_v4, %v2084_v22  ;;  %v813_v43 = vsel %vm781_vm2, %v1520_v57, 128  ;;  %v815_v50 = vsel %vm783_vm3, %v1530_v63, 128  ;;  %vm837_vm0 = vcmp.lt.s32.totalorder %v834_v44, %v809_v35  ;;  %v1221_v13 = vpop.eup %1220 }
 0x1d1   :  { %vm839_vm1 = vcmp.lt.s32.totalorder %v836_v53, %v811_v38  ;;  %v575_v10 = vadd.f32 %v1215_v17, %v574_v7  ;;  %v838_v1 = vsel %vm837_vm0, %v834_v44, %v809_v35  ;;  %v610_v5 = vrot.slane %v609_v59, 1  ;;  %v1223_v58 = vpop.eup %1222  ;;  %v2086_v17 = vld [vmem:[#allocation24_spill] sm:$0xff] }
 0x1d2   :  { %v840_v51 = vsel %vm839_vm1, %v836_v53, %v811_v38  ;;  %v817_v45 = vsel %vm785_vm4, %v1540_v4, 128  ;;  %v819_v12 = vsel %vm787_vm5, %v1550_v9, 128  ;;  %vm841_vm2 = vcmp.lt.s32.totalorder %v838_v1, %v813_v43  ;;  %v1225_v3 = vpop.eup %1224 }
 0x1d3   :  { %vm843_vm3 = vcmp.lt.s32.totalorder %v840_v51, %v815_v50  ;;  %v576_v47 = vadd.f32 %v1217_v39, %v575_v10  ;;  %v842_v60 = vsel %vm841_vm2, %v838_v1, %v813_v43  ;;  %v611_v20 = vadd.f32 %v610_v5, %v609_v59  ;;  %v1227_v55 = vpop.eup %1226 }
 0x1d4   :  { %v844_v19 = vsel %vm843_vm3, %v840_v51, %v815_v50  ;;  %v821_v62 = vsel %vm789_vm6, %v1560_v14, 128  ;;  %v823_v33 = vsel %vm791_vm7, %v1570_v26, 128  ;;  %vm845_vm4 = vcmp.lt.s32.totalorder %v842_v60, %v817_v45  ;;  %v1229_v11 = vpop.eup %1228 }
 0x1d5   :  { %vm847_vm5 = vcmp.lt.s32.totalorder %v844_v19, %v819_v12  ;;  %v577_v49 = vadd.f32 %v1219_v37, %v576_v47  ;;  %v846_v8 = vsel %vm845_vm4, %v842_v60, %v817_v45  ;;  %1234 = vlog2.f32 %v611_v20  ;;  %v2089_v20 = vld [vmem:[#allocation23_spill] sm:$0xff] }
 0x1d6   :  { %v848_v16 = vsel %vm847_vm5, %v844_v19, %v819_v12  ;;  %v691_v18 = vsel %vm659_vm8, %v2074_v42, 0.0  ;;  %v825_v21 = vsel %vm793_vm9, %v1589_v52, 128  ;;  %vm849_vm6 = vcmp.lt.s32.totalorder %v846_v8, %v821_v62  ;;  %v1231_v24 = vpop.eup %1230 }
 0x1d7   :  { %vm851_vm12 = vcmp.lt.s32.totalorder %v848_v16, %v823_v33  ;;  %v578_v25 = vadd.f32 %v1221_v13, %v577_v49  ;;  %v827_v29 = vsel %vm795_vm10, %v2085_v27, 128  ;;  %v850_v31 = vsel %vm849_vm6, %v846_v8, %v821_v62  ;;  %v1233_v34 = vpop.eup %1232 }
 0x1d8   :  { %v852_v32 = vsel %vm851_vm12, %v848_v16, %v823_v33  ;;  %v693_v57 = vsel %vm661_vm13, %v2075_v15, 0.0  ;;  %v904_v42 = vrot.slane %v1842_v48, 1  ;;  %vm853_vm7 = vcmp.lt.s32.totalorder %v850_v31, %v825_v21 }
 0x1d9   :  { %vm855_vm8 = vcmp.lt.s32.totalorder %v852_v32, %v827_v29  ;;  %v745_v41 = vrot.slane %v1836_v0, 2  ;;  %v579_v6 = vadd.f32 %v1223_v58, %v578_v25  ;;  %v854_v56 = vsel %vm853_vm7, %v850_v31, %v825_v21  ;;  %v2088_v58 = vld [vmem:[#allocation8_spill] sm:$0xff] }
 0x1da   :  { %v856_v30 = vsel %vm855_vm8, %v852_v32, %v827_v29  ;;  %v714_v35 = vadd.f32 %v2086_v17, %v691_v18  ;;  %vm665_vm9 = vcmp.eq.s32.totalorder %v1550_v9, %v2084_v22  ;;  %v695_v63 = vsel %vm663_vm11, %v2076_v40, 0.0 }
 0x1db   :  { %vm857_vm10 = vcmp.lt.s32.totalorder %v854_v56, %v856_v30  ;;  %v580_v15 = vadd.f32 %v1225_v3, %v579_v6  ;;  %vm667_vm13 = vcmp.eq.s32.totalorder %v1560_v14, %v2084_v22  ;;  %vm905_vm14 = vcmp.lt.s32.totalorder %v1842_v48, %v904_v42 }
 0x1dc   :  { %v858_v38 = vsel %vm857_vm10, %v854_v56, %v856_v30  ;;  %v715_v39 = vadd.f32 %v714_v35, %v693_v57  ;;  %v697_v44 = vsel %vm665_vm9, %v2077_v28, 0.0  ;;  %vm669_vm15 = vcmp.eq.s32.totalorder %v1570_v26, %v2084_v22 }
 0x1dd   :  { %v859_v7 = vrot.slane %v858_v38, 4  ;;  %v746_v9 = vadd.f32 %v745_v41, %v1836_v0  ;;  %v581_v53 = vadd.f32 %v1227_v55, %v580_v15  ;;  %v2087_v4 = vlaneseq }
 0x1de   :  { %v716_v59 = vadd.f32 %v715_v39, %v695_v63  ;;  %v699_v37 = vsel %vm667_vm13, %v2078_v54, 0.0  ;;  %v906_v14 = vsel %vm905_vm14, %v1842_v48, %v904_v42  ;;  %vm671_vm11 = vcmp.eq.s32.totalorder %v1589_v52, %v2084_v22 }
 0x1df   :  { %vm860_vm0 = vcmp.lt.s32.totalorder %v858_v38, %v859_v7  ;;  %v915_v40 = vand.u32 127, %v2087_v4  ;;  %v582_v43 = vadd.f32 %v1229_v11, %v581_v53  ;;  %vm673_vm1 = vcmp.eq.s32.totalorder %v2085_v27, %v2084_v22 }
 0x1e0   :  { %v861_v50 = vsel %vm860_vm0, %v858_v38, %v859_v7  ;;  %v717_v13 = vadd.f32 %v716_v59, %v697_v44  ;;  %v701_v28 = vsel %vm669_vm15, %v2079_v36, 0.0  ;;  %v747_v0 = vrot.slane %v746_v9, 1 }
 0x1e1   :  { %v862_v26 = vrot.slane %v861_v50, 2  ;;  %v583_v10 = vadd.f32 %v1231_v24, %v582_v43  ;;  %v1294_v54 = vmov 1966171168   ;;  %vm908_vm3 = vcmp.eq.s32.totalorder %v906_v14, %v2088_v58 }
 0x1e2   :  { %v1235_v1 = vpop.eup %1234  ;;  %v718_v51 = vadd.f32 %v717_v13, %v699_v37  ;;  %v932_v5 = vunpack.c.l.s4 %v1294_v54  ;;  %vm920_vm4 = vcmp.lt.s32.totalorder %v915_v40, 16  ;;  %v703_v47 = vsel %vm671_vm11, %v2080_v46, 0.0 }
 0x1e3   :  { %vm863_vm2 = vcmp.lt.s32.totalorder %v861_v50, %v862_v26  ;;  %v584_v48 = vadd.f32 %v1233_v34, %v583_v10  ;;  %v615_v12 = vmul.f32 0.6931472, %v1235_v1  ;;  %v748_v60 = vadd.f32 %v747_v0, %v746_v9 }
 0x1e4   :  { %v864_v45 = vsel %vm863_vm2, %v861_v50, %v862_v26  ;;  %v719_v3 = vadd.f32 %v718_v51, %v701_v28  ;;  %v1295_v62 = vmov 0.0   ;;  %v705_v11 = vsel %vm673_vm1, %v2081_v2, 0.0 }
 0x1e5   :  { %v865_v36 = vrot.slane %v864_v45, 1  ;;  %v585_v19 = vrot.slane %v584_v48, 4  ;;  %v617_v55 = vadd.f32 %v615_v12, %v2089_v20  ;;  %v1036_v33 = vsel %vm908_vm3, 1.0, %v1295_v62 }
 0x1e6   :  { %v1984_v49 = vsel %vm920_vm4, 1.0, %v1295_v62  ;;  %v933_v8 = vunpack.c.0.s8 %v932_v5  ;;  %v720_v16 = vadd.f32 %v719_v3, %v703_v47  ;;  %v952_v21 = vmul.f32 0.0, %v1036_v33 }
 0x1e7   :  { %vm866_vm5 = vcmp.lt.s32.totalorder %v864_v45, %v865_v36  ;;  %v586_v18 = vadd.f32 %v585_v19, %v584_v48  ;;  %v750_v52 = vsub.f32 %v617_v55, %v748_v60  ;;  %vm1996_vm12 = vcmp.lt.s32.totalorder %v2087_v4, 256 }
 0x1e8   :  { %v867_v46 = vsel %vm866_vm5, %v864_v45, %v865_v36  ;;  %v721_v25 = vadd.f32 %v720_v16, %v705_v11  ;;  %v1990_v32 = vsub.s32 %v933_v8, %v1440_v23 }
 0x1e9   :  { %vm907_vm6 = vcmp.eq.s32.totalorder %v867_v46, %v2084_v22  ;;  %v587_v24 = vrot.slane %v586_v18, 2  ;;  %v1987_v29 = vmax.f32 %v750_v52, 0.0 }
 0x1ea   :  { %v1035_v31 = vsel %vm907_vm6, 1.0, %v1295_v62  ;;  %v722_v41 = vrot.slane %v721_v25, 4 }
 0x1eb   :  { %v951_v2 = vmul.f32 %v1984_v49, %v1035_v31  ;;  %v588_v27 = vadd.f32 %v587_v24, %v586_v18  ;;  %v754_v34 = vsub.f32 0.0, %v1987_v29 }
 0x1ec   :  { %v723_v17 = vadd.f32 %v722_v41, %v721_v25 }
 0x1ed   :  { %v955_v57 = vcombine.low %v951_v2, %v952_v21  ;;  %v589_v42 = vrot.slane %v588_v27, 1  ;;  %v757_v6 = vmul.f32 1.442695, %v754_v34 }
 0x1ef   :  { %v962_v22 = vrot.slane %v955_v57, %v1990_v32  ;;  %v590_v56 = vadd.f32 %v589_v42, %v588_v27  ;;  %1236 = vpow2.f32 %v757_v6 }
 0x1f1   :  { %v969_v23 = vrot.slane %v962_v22, %v1990_v32  ;;  %1238 = vlog2.f32 %v590_v56 }
 0x1f3   :  { %971 = vst.msk [vmem:[#allocation4] sm:$0x3] %vm1996_vm12, %v969_v23 }
 0x1f4   :  { %1261 = shalt.err (!%p1258_p4)
}
 0x1f5   :  { %991 = dma.vmem_to_hbm [thread:$0]  %s989_s29, 32, %s2021_s5, [#allocation5]   ;;  %v724_v35 = vrot.slane %v723_v17, 2 }
 0x1f6   :  { %s1297_s5 = smov [#allocation2]  }
 0x1f7   :  { %v725_v63 = vadd.f32 %v724_v35, %v723_v17  ;;  %s978_s8 = sshll.u32 %s1297_s5, 4  ;;  %s979_s8 = int_to_ptr.vmem [resolvable:$true] %s978_s8 }
 0x1f8   :  { %s1270_s9 = scalar_lea.vmem %s979_s8, 32  ;;  %p1275_p6 = scmp.lt.s32.totalorder %s979_s8, %s979_s8 }
 0x1f9   :  { %v726_v38 = vrot.slane %v725_v63, 1  ;;  %p1271_p5 = scmp.ne.s32.totalorder %s979_s8, %s1270_s9  ;;  %p1276_p7 = scmp.lt.s32.totalorder %s1270_s9, %s1270_s9 }
 0x1fb   :  { %v727_v53 = vadd.f32 %v726_v38, %v725_v63  ;;  %p1277_p8 = por %p1276_p7, %p1275_p6 }
 0x1fc   :  { %v1237_v15 = vpop.eup %1236 }
 0x1fd   :  { %v760_v44 = vsub.f32 1.0, %v1237_v15  ;;  %p1278_p9 = pnand %p1277_p8, %p1271_p5 }
 0x1fe   :  { %v1239_v39 = vpop.eup %1238 }
 0x1ff   :  { %v613_v7 = vmul.f32 0.6931472, %v1239_v39  ;;  %v1126_v4 = vand.u32 2147483647, %v760_v44  ;;  %vm1130_vm7 = vcmp.lt.f32.partialorder %v760_v44, 0  ;;  %vm1131_vm8 = vcmp.eq.f32.partialorder %v760_v44, 0 }
 0x200   :  { %vm1143_vm10 = vcmp.ne.f32.partialorder %v760_v44, %v760_v44  ;;  %vm1132_vm13 = vcmp.eq.f32.partialorder %v760_v44, 1065353216 }
 0x201   :  { %v616_v9 = vadd.f32 %v613_v7, %v1681_v61  ;;  %1240 = vlog2.f32 %v1126_v4  ;;  %vm1135_vm9 = vcmp.eq.f32.partialorder %v1126_v4, 2139095040 }
 0x203   :  { %v749_v59 = vsub.f32 %v616_v9, %v727_v53 }
 0x205   :  { %v751_v40 = vmax.f32 %v749_v59, 0.0 }
 0x207   :  { %v753_v37 = vsub.f32 0.0, %v751_v40 }
 0x209   :  { %v755_v43 = vmul.f32 1.442695, %v753_v37 }
 0x20b   :  { %1242 = vpow2.f32 %v755_v43 }
 0x20e   :  { %v1241_v50 = vpop.eup %1240 }
 0x20f   :  { %v1128_v13 = vmul.f32 0.01, %v1241_v50 }
 0x211   :  { %1244 = vpow2.f32 %v1128_v13 }
 0x218   :  { %v1243_v14 = vpop.eup %1242 }
 0x219   :  { %v759_v26 = vsub.f32 1.0, %v1243_v14 }
 0x21b   :  { %v1100_v28 = vand.u32 2147483647, %v759_v26  ;;  %vm1104_vm14 = vcmp.lt.f32.partialorder %v759_v26, 0  ;;  %vm1105_vm15 = vcmp.eq.f32.partialorder %v759_v26, 0  ;;  %vm1117_vm11 = vcmp.ne.f32.partialorder %v759_v26, %v759_v26 }
 0x21c   :  { %vm1106_vm1 = vcmp.eq.f32.partialorder %v759_v26, 1065353216 }
 0x21d   :  { %1246 = vlog2.f32 %v1100_v28  ;;  %vm1109_vm0 = vcmp.eq.f32.partialorder %v1100_v28, 2139095040 }
 0x21e   :  { %v1245_v0 = vpop.eup %1244 }
 0x21f   :  { %v1136_v61 = vsel %vm1130_vm7, 2143289344, %v1245_v0 }
 0x220   :  { %v1137_v51 = vsel %vm1131_vm8, 0, %v1136_v61 }
 0x221   :  { %v1142_v54 = vsel %vm1135_vm9, 2139095040, %v1137_v51 }
 0x222   :  { %v1146_v5 = vsel %vm1143_vm10, 2143289344, %v1142_v54 }
 0x223   :  { %v1147_v58 = vsel %vm1132_vm13, 1065353216, %v1146_v5 }
 0x224   :  { %v764_v3 = vmul.f32 %v1147_v58, %v1987_v29 }
 0x226   :  { %v927_v20 = vmul.f32 0.0, %v764_v3 }
 0x22a   :  { %v1247_v10 = vpop.eup %1246 }
 0x22b   :  { %v1102_v1 = vmul.f32 0.01, %v1247_v10 }
 0x22d   :  { %1248 = vpow2.f32 %v1102_v1 }
 0x23a   :  { %v1249_v48 = vpop.eup %1248 }
 0x23b   :  { %v1110_v45 = vsel %vm1104_vm14, 2143289344, %v1249_v48 }
 0x23c   :  { %v1111_v12 = vsel %vm1105_vm15, 0, %v1110_v45 }
 0x23d   :  { %v1116_v47 = vsel %vm1109_vm0, 2139095040, %v1111_v12 }
 0x23e   :  { %v1120_v36 = vsel %vm1117_vm11, 2143289344, %v1116_v47 }
 0x23f   :  { %v1121_v60 = vsel %vm1106_vm1, 1065353216, %v1120_v36 }
 0x240   :  { %v763_v19 = vmul.f32 %v1121_v60, %v751_v40 }
 0x242   :  { %v926_v55 = vmul.f32 %v1984_v49, %v763_v19 }
 0x244   :  { %v930_v62 = vcombine.low %v926_v55, %v927_v20 }
 0x246   :  { %v937_v33 = vrot.slane %v930_v62, %v1990_v32 }
 0x248   :  { %v944_v11 = vrot.slane %v937_v33, %v1990_v32 }
 0x24a   :  { %950 = vst.msk [vmem:[#allocation2] sm:$0x3] %vm1996_vm12, %v944_v11 }
 0x24b   :  { %1281 = shalt.err (!%p1278_p9)
}
 0x24c   :  { %981 = dma.vmem_to_hbm [thread:$0]  %s979_s8, 32, %s2020_s4, [#allocation3]  }
 0x24d   :  { %1290 = dma.done.wait [#allocation3], 32  }
 0x24e   :  { %1291 = vsyncadd [#allocation3], 4294967264 }
 0x24f   :  { %1292 = dma.done.wait [#allocation5], 32  }
 0x250   :  { %1293 = vsyncadd [#allocation5], 4294967264 }
 0x251   :  { %998 = vsyncpa [#allocation3], 1 }
 0x252   :  { %999 = vsyncpa [#allocation5], 1 }

</bundles_post_ra>
